<compile_context>
chip_gen: v7x
topology: tpu7x:2x2x1
jax: 0.10.0
libtpu: 0.0.40
codegen_flags: <defaults>
</compile_context>

<pallas_src>
import functools
from math import sqrt

import jax
import jax.numpy as jnp
from jax import lax
from jax.experimental import pallas as pl
from jax.experimental.pallas import tpu as pltpu


def _mmhsa_kernel(q_ref, k_ref, v_ref, wt_ref, b_ref, o_ref,
                  m_sc, l_sc, acc_sc, *, scale, tq, tk, seq_len, padded):
    """One (batch, q-tile, kv-tile) grid step.

    q_ref : (1, tq, D) bf16    k_ref : (1, tk, D) bf16    v_ref : (1, tk, D) bf16
    wt_ref: (D, E) bf16        b_ref : (1, E) bf16        o_ref : (1, tq, E)
    m_sc, l_sc : (tq, 1) f32 running max / denom ; acc_sc : (tq, D) f32 numerator
    """
    qi = pl.program_id(1)
    ki = pl.program_id(2)

    @pl.when(ki == 0)
    def _init():
        m_sc[...] = jnp.full_like(m_sc, -jnp.inf)
        l_sc[...] = jnp.zeros_like(l_sc)
        acc_sc[...] = jnp.zeros_like(acc_sc)

    q_start = qi * tq
    k_start = ki * tk

    # Tile classification (cheap scalar predicates).
    above_diag = k_start > q_start + (tq - 1)    # every key idx > every query idx
    below_diag = k_start + (tk - 1) <= q_start   # every key idx <= every query idx
    if padded:
        no_pad = (k_start + tk) <= seq_len       # tile has no padded key columns
        is_const = jnp.logical_and(above_diag, no_pad)
        is_plain = jnp.logical_and(below_diag, no_pad)
    else:
        is_const = above_diag
        is_plain = below_diag
    is_general = jnp.logical_not(jnp.logical_or(is_const, is_plain))

    def scores():
        # (tq, D) x (tk, D) contracting the last dims -> (tq, tk), f32 acc.
        s = lax.dot_general(q_ref[0], k_ref[0],
                            dimension_numbers=(((1,), (1,)), ((), ())),
                            preferred_element_type=jnp.float32)
        return s * scale + 1e-13

    def accumulate(s):
        m_prev = m_sc[...]
        m_new = jnp.maximum(m_prev, jnp.max(s, axis=-1, keepdims=True))
        alpha = jnp.exp(m_prev - m_new)
        p = jnp.exp(s - m_new)
        l_sc[...] = alpha * l_sc[...] + jnp.sum(p, axis=-1, keepdims=True)
        acc_sc[...] = alpha * acc_sc[...] + jnp.dot(
            p.astype(v_ref.dtype), v_ref[0], preferred_element_type=jnp.float32)
        m_sc[...] = m_new

    @pl.when(is_general)
    def _general():
        # Diagonal-crossing tiles (and any tile holding padded key columns).
        s = scores()
        row = q_start + lax.broadcasted_iota(jnp.int32, (tq, 1), 0)
        col = k_start + lax.broadcasted_iota(jnp.int32, (1, tk), 1)
        s = jnp.where(col > row, jnp.float32(-1e-13), s)
        if padded:
            # Padded keys must contribute 0 to the softmax (unlike the
            # module's -1e-13 fill for real masked positions).
            s = jnp.where(col >= seq_len, jnp.float32(-jnp.inf), s)
        accumulate(s)

    @pl.when(is_plain)
    def _plain():
        # Fully-unmasked tile: skip the iota/compare/select entirely.
        accumulate(scores())

    @pl.when(is_const)
    def _const():
        # Fully-masked tile: every score equals the fill (-1e-13).  Skip the
        # QK^T matmul, the mask select and the full (tq,tk) exp; P@V collapses
        # to exp(c - m_new) * column-sum(V).
        c = jnp.float32(-1e-13)
        m_prev = m_sc[...]
        m_new = jnp.maximum(m_prev, c)
        alpha = jnp.exp(m_prev - m_new)
        p_row = jnp.exp(c - m_new)                                        # (tq, 1)
        v_sum = jnp.sum(v_ref[0].astype(jnp.float32), axis=0, keepdims=True)  # (1, D)
        l_sc[...] = alpha * l_sc[...] + jnp.float32(tk) * p_row
        acc_sc[...] = alpha * acc_sc[...] + p_row * v_sum
        m_sc[...] = m_new

    # Finalize: normalize and apply the fused Linear on this q-tile.
    @pl.when(ki == pl.num_programs(2) - 1)
    def _done():
        inv_l = pl.reciprocal(l_sc[...], approx=True)
        ar = (acc_sc[...] * inv_l).astype(wt_ref.dtype)     # (tq, D) bf16 for MXU
        out = jnp.dot(ar, wt_ref[...], preferred_element_type=jnp.float32)
        o_ref[0] = (out + b_ref[...].astype(jnp.float32)).astype(o_ref.dtype)


def _choose_tiles(seq_len, max_tile=512):
    """Return (tile, padded_seq_len).

    The tile is either the full sequence (short S; block == full extent so the
    (8,128) rule is satisfied) or a multiple of 128 from {512, 256, 128}.  If
    no aligned tile divides S, S is padded up to a multiple of 128; padded key
    columns are masked to -inf inside the kernel.
    """
    if seq_len <= max_tile:
        return seq_len, seq_len
    for t in (512, 256, 128):
        if t <= max_tile and seq_len % t == 0:
            return t, seq_len
    padded = ((seq_len + 127) // 128) * 128
    for t in (512, 256, 128):
        if t <= max_tile and padded % t == 0:
            return t, padded
    return 128, padded


def masked_multihead_self_attention(Q, K, V, W, bias, *, max_tile=512):
    """Q, K: (B, S, D); V: (B, D, S); W: (E, D); bias: (E,)  ->  (B, S, E)."""
    B, S, D = Q.shape
    E = W.shape[0]
    t, S_pad = _choose_tiles(S, max_tile)
    tq = tk = t
    n_q, n_kv = S_pad // tq, S_pad // tk
    padded = S_pad != S

    # One-time layout / dtype prep in XLA (outside the kernel):
    #   Q, K stay in native (B, S, D) layout (QK^T contracts the last dims);
    #   V -> (B, S, D) so P@V is (M,K)@(K,N); W -> (D, E) bf16; bias -> (1, E).
    q = Q.astype(jnp.bfloat16)
    k = K.astype(jnp.bfloat16)
    v_t = jnp.swapaxes(V, 1, 2).astype(jnp.bfloat16)
    w_t = jnp.swapaxes(W, 0, 1).astype(jnp.bfloat16)
    b2 = bias.reshape(1, E).astype(jnp.bfloat16)

    if padded:
        pad = S_pad - S
        q = jnp.pad(q, ((0, 0), (0, pad), (0, 0)))
        k = jnp.pad(k, ((0, 0), (0, pad), (0, 0)))
        v_t = jnp.pad(v_t, ((0, 0), (0, pad), (0, 0)))

    # VMEM budget from the actual buffer counts (2 per pipelined block) and
    # dtypes, plus scratch and the f32 score/prob working set.  Cap is
    # generation-aware and never clamps below the real requirement.
    out_isz = jnp.dtype(Q.dtype).itemsize
    blocks = 2 * (tq * D * 2            # Q block (bf16), double-buffered
                  + 2 * tk * D * 2      # K and V blocks (bf16)
                  + D * E * 2 + E * 2   # W^T and bias (bf16, constant index)
                  + tq * E * out_isz)   # output block
    scratch = (2 * tq + tq * D) * 4
    working = 3 * tq * tk * 4
    needed = blocks + scratch + working
    try:
        kind = jax.devices()[0].device_kind.lower()
    except Exception:
        kind = ""
    is_v7 = (not kind) or any(tag in kind for tag in ("v7", "7x", "tpu7"))
    cap = (40 << 20) if is_v7 else (100 << 20)   # v7x has only 64 MiB VMEM total
    vmem_limit = int(max(min(2 * needed, cap), needed + (4 << 20), 16 << 20))

    kernel = functools.partial(_mmhsa_kernel, scale=1.0 / sqrt(D),
                               tq=tq, tk=tk, seq_len=S, padded=padded)
    out = pl.pallas_call(
        kernel,
        out_shape=jax.ShapeDtypeStruct((B, S_pad, E), Q.dtype),
        grid_spec=pltpu.PrefetchScalarGridSpec(
            num_scalar_prefetch=0,
            grid=(B, n_q, n_kv),
            in_specs=[
                pl.BlockSpec((1, tq, D), lambda b, qi, ki: (b, qi, 0)),  # Q
                pl.BlockSpec((1, tk, D), lambda b, qi, ki: (b, ki, 0)),  # K
                pl.BlockSpec((1, tk, D), lambda b, qi, ki: (b, ki, 0)),  # V^T
                pl.BlockSpec((D, E),     lambda b, qi, ki: (0, 0)),      # W^T
                pl.BlockSpec((1, E),     lambda b, qi, ki: (0, 0)),      # bias
            ],
            out_specs=pl.BlockSpec((1, tq, E), lambda b, qi, ki: (b, qi, 0)),
            scratch_shapes=[
                pltpu.VMEM((tq, 1), jnp.float32),   # running max
                pltpu.VMEM((tq, 1), jnp.float32),   # running denom
                pltpu.VMEM((tq, D), jnp.float32),   # running numerator
            ],
        ),
        compiler_params=pltpu.CompilerParams(
            dimension_semantics=("parallel", "parallel", "arbitrary"),
            vmem_limit_bytes=vmem_limit,
        ),
    )(q, k, v_t, w_t, b2)

    return out[:, :S, :] if padded else out


def _reference(Q, K, V, W, bias):
    B, S, D = Q.shape
    scores = jnp.einsum("bsd,btd->bst", Q, K) / sqrt(D) + 1e-13
    row = lax.broadcasted_iota(jnp.int32, (S, S), 0)
    col = lax.broadcasted_iota(jnp.int32, (S, S), 1)
    scores = jnp.where((col > row)[None], jnp.float32(-1e-13), scores)
    attn = jax.nn.softmax(scores, axis=2)
    ar = jnp.einsum("bst,bdt->bsd", attn, V)
    return jnp.einsum("bsd,ed->bse", ar, W) + bias[None, None, :]


if __name__ == "__main__":
    def run_case(B, S, model_dim, embed_dim, key):
        kq, kk, kv, kw, kb = jax.random.split(key, 5)
        Q = jax.random.normal(kq, (B, S, model_dim), dtype=jnp.float32)
        K = jax.random.normal(kk, (B, S, model_dim), dtype=jnp.float32)
        V = jax.random.normal(kv, (B, model_dim, S), dtype=jnp.float32)
        # deterministic nn.Linear-style init: U(-1/sqrt(model_dim), 1/sqrt(model_dim))
        lim = 1.0 / sqrt(model_dim)
        W = jax.random.uniform(kw, (embed_dim, model_dim), jnp.float32, -lim, lim)
        bias = jax.random.uniform(kb, (embed_dim,), jnp.float32, -lim, lim)

        out = jax.block_until_ready(masked_multihead_self_attention(Q, K, V, W, bias))
        ref = _reference(Q, K, V, W, bias)
        assert out.shape == (B, S, embed_dim)
        # 3e-2 tolerance: Q/K/V/W and attention probs go through bf16 MXU inputs
        # (f32 accumulation); reference is pure f32.
        err = float(jnp.max(jnp.abs(out - ref)))
        assert err < 3e-2, f"max abs err {err} at B={B}, S={S}"

    key1, key2 = jax.random.split(jax.random.PRNGKey(0))
    # Small shape consistent with the module (single full-extent tile path).
    run_case(B=2, S=8, model_dim=32, embed_dim=16, key=key1)
    # Multi-tile path: exercises fully-masked / fully-unmasked / diagonal tile
    # gating plus the pad-to-multiple-of-128 -inf key masking (S=600 -> 640).
    run_case(B=1, S=600, model_dim=32, embed_dim=16, key=key2)

    print("KERNEL_OK")
</pallas_src>

<mosaic_0001>
module attributes {stable_mosaic.version = 11 : i64} {
  func.func @_mmhsa_kernel(%arg0: i32, %arg1: i32, %arg2: i32, %arg3: memref<1x8x32xbf16, #tpu.memory_space<vmem>>, %arg4: memref<1x8x32xbf16, #tpu.memory_space<vmem>>, %arg5: memref<1x8x32xbf16, #tpu.memory_space<vmem>>, %arg6: memref<32x16xbf16, #tpu.memory_space<vmem>>, %arg7: memref<1x16xbf16, #tpu.memory_space<vmem>>, %arg8: memref<1x8x16xf32, #tpu.memory_space<vmem>>, %arg9: memref<8x1xf32, #tpu.memory_space<vmem>>, %arg10: memref<8x1xf32, #tpu.memory_space<vmem>>, %arg11: memref<8x32xf32, #tpu.memory_space<vmem>>) attributes {dimension_semantics = [#tpu.dimension_semantics<parallel>, #tpu.dimension_semantics<parallel>, #tpu.dimension_semantics<arbitrary>], iteration_bounds = array<i64: 2, 1, 1>, scalar_prefetch = 0 : i64, scratch_operands = 3 : i64, tpu.core_type = #tpu.core_type<tc>, window_params = [{transform_indices = @transform_0, window_bounds = array<i64: 1, 8, 32>}, {transform_indices = @transform_1, window_bounds = array<i64: 1, 8, 32>}, {transform_indices = @transform_2, window_bounds = array<i64: 1, 8, 32>}, {pipeline_mode = #tpu.pipeline_mode<synchronous>, transform_indices = @transform_3, window_bounds = array<i64: 32, 16>}, {pipeline_mode = #tpu.pipeline_mode<synchronous>, transform_indices = @transform_4, window_bounds = array<i64: 1, 16>}, {transform_indices = @transform_5, window_bounds = array<i64: 1, 8, 16>}]} {
    %c0_i32 = arith.constant 0 : i32
    %0 = arith.cmpi eq, %arg2, %c0_i32 : i32
    %1 = arith.extui %0 : i1 to i32
    %c0_i32_0 = arith.constant 0 : i32
    %2 = arith.cmpi ne, %1, %c0_i32_0 : i32
    scf.if %2 {
      %cst = arith.constant 0xFF800000 : f32
      %20 = vector.broadcast %cst : f32 to vector<8x1xf32>
      %c0 = arith.constant 0 : index
      %c0_8 = arith.constant 0 : index
      %21 = vector.load %arg9[%c0, %c0_8] : memref<8x1xf32, #tpu.memory_space<vmem>>, vector<8x1xf32>
      tpu.vector_store %arg9[%c0, %c0_8], %20 {strides = array<i32>} : memref<8x1xf32, #tpu.memory_space<vmem>>, vector<8x1xf32>,
      %cst_9 = arith.constant 0.000000e+00 : f32
      %22 = vector.broadcast %cst_9 : f32 to vector<8x1xf32>
      %c0_10 = arith.constant 0 : index
      %c0_11 = arith.constant 0 : index
      %23 = vector.load %arg10[%c0_10, %c0_11] : memref<8x1xf32, #tpu.memory_space<vmem>>, vector<8x1xf32>
      tpu.vector_store %arg10[%c0_10, %c0_11], %22 {strides = array<i32>} : memref<8x1xf32, #tpu.memory_space<vmem>>, vector<8x1xf32>,
      %cst_12 = arith.constant 0.000000e+00 : f32
      %24 = vector.broadcast %cst_12 : f32 to vector<8x32xf32>
      %c0_13 = arith.constant 0 : index
      %c0_14 = arith.constant 0 : index
      %25 = vector.load %arg11[%c0_13, %c0_14] : memref<8x32xf32, #tpu.memory_space<vmem>>, vector<8x32xf32>
      tpu.vector_store %arg11[%c0_13, %c0_14], %24 {strides = array<i32>} : memref<8x32xf32, #tpu.memory_space<vmem>>, vector<8x32xf32>,
    } else {
    }
    %c8_i32 = arith.constant 8 : i32
    %3 = arith.muli %arg1, %c8_i32 : i32
    %c8_i32_1 = arith.constant 8 : i32
    %4 = arith.muli %arg2, %c8_i32_1 : i32
    %c7_i32 = arith.constant 7 : i32
    %5 = arith.addi %3, %c7_i32 : i32
    %6 = arith.cmpi sgt, %4, %5 : i32
    %c7_i32_2 = arith.constant 7 : i32
    %7 = arith.addi %4, %c7_i32_2 : i32
    %8 = arith.cmpi sle, %7, %3 : i32
    %9 = arith.ori %6, %8 : i1
    %true = arith.constant true
    %10 = arith.xori %9, %true : i1
    %11 = arith.extui %10 : i1 to i32
    %c0_i32_3 = arith.constant 0 : i32
    %12 = arith.cmpi ne, %11, %c0_i32_3 : i32
    scf.if %12 {
      %c0 = arith.constant 0 : index
      %c0_8 = arith.constant 0 : index
      %c0_9 = arith.constant 0 : index
      %20 = vector.load %arg3[%c0, %c0_8, %c0_9] : memref<1x8x32xbf16, #tpu.memory_space<vmem>>, vector<1x8x32xbf16>
      %21 = vector.shape_cast %20 : vector<1x8x32xbf16> to vector<8x32xbf16>
      %c0_10 = arith.constant 0 : index
      %c0_11 = arith.constant 0 : index
      %c0_12 = arith.constant 0 : index
      %22 = vector.load %arg4[%c0_10, %c0_11, %c0_12] : memref<1x8x32xbf16, #tpu.memory_space<vmem>>, vector<1x8x32xbf16>
      %23 = vector.shape_cast %22 : vector<1x8x32xbf16> to vector<8x32xbf16>
      %cst = arith.constant dense<0.000000e+00> : vector<8x8xf32>
      %24 = tpu.matmul %21, %23, %cst {dimension_numbers = #tpu.dot_dimension_numbers<[1], [1], [0], [0], [0, 0, 1, 0], [], []>} : vector<8x32xbf16>, vector<8x32xbf16>, vector<8x8xf32> -> vector<8x8xf32>
      %cst_13 = arith.constant 0.176776692 : f32
      %25 = vector.broadcast %cst_13 : f32 to vector<8x8xf32>
      %26 = arith.mulf %24, %25 : vector<8x8xf32>
      %cst_14 = arith.constant 9.99999982E-14 : f32
      %27 = vector.broadcast %cst_14 : f32 to vector<8x8xf32>
      %28 = arith.addf %26, %27 : vector<8x8xf32>
      %29 = tpu.iota {dimensions = array<i32: 0>} : vector<8x1xi32>
      %30 = vector.broadcast %3 : i32 to vector<8x1xi32>
      %31 = arith.addi %30, %29 : vector<8x1xi32>
      %32 = tpu.iota {dimensions = array<i32: 1>} : vector<1x8xi32>
      %33 = vector.broadcast %4 : i32 to vector<1x8xi32>
      %34 = arith.addi %33, %32 : vector<1x8xi32>
      %35 = vector.broadcast %34 : vector<1x8xi32> to vector<8x8xi32>
      %36 = vector.broadcast %31 : vector<8x1xi32> to vector<8x8xi32>
      %37 = arith.cmpi sgt, %35, %36 : vector<8x8xi32>
      %cst_15 = arith.constant -9.99999982E-14 : f32
      %38 = vector.broadcast %cst_15 : f32 to vector<8x8xf32>
      %39 = arith.select %37, %38, %28 : vector<8x8xi1>, vector<8x8xf32>
      %c0_16 = arith.constant 0 : index
      %c0_17 = arith.constant 0 : index
      %40 = vector.load %arg9[%c0_16, %c0_17] : memref<8x1xf32, #tpu.memory_space<vmem>>, vector<8x1xf32>
      %cst_18 = arith.constant dense<0xFF800000> : vector<8xf32>
      %41 = vector.multi_reduction <maximumf>, %39, %cst_18 [1] : vector<8x8xf32> to vector<8xf32>
      %42 = vector.shape_cast %41 : vector<8xf32> to vector<8x1xf32>
      %43 = arith.maximumf %40, %42 : vector<8x1xf32>
      %44 = arith.subf %40, %43 : vector<8x1xf32>
      %45 = math.exp %44 : vector<8x1xf32>
      %46 = vector.broadcast %43 : vector<8x1xf32> to vector<8x8xf32>
      %47 = arith.subf %39, %46 : vector<8x8xf32>
      %48 = math.exp %47 : vector<8x8xf32>
      %c0_19 = arith.constant 0 : index
      %c0_20 = arith.constant 0 : index
      %49 = vector.load %arg10[%c0_19, %c0_20] : memref<8x1xf32, #tpu.memory_space<vmem>>, vector<8x1xf32>
      %50 = arith.mulf %45, %49 : vector<8x1xf32>
      %cst_21 = arith.constant dense<0.000000e+00> : vector<8xf32>
      %51 = vector.multi_reduction <add>, %48, %cst_21 [1] : vector<8x8xf32> to vector<8xf32>
      %52 = vector.shape_cast %51 : vector<8xf32> to vector<8x1xf32>
      %53 = arith.addf %50, %52 : vector<8x1xf32>
      %c0_22 = arith.constant 0 : index
      %c0_23 = arith.constant 0 : index
      %54 = vector.load %arg10[%c0_22, %c0_23] : memref<8x1xf32, #tpu.memory_space<vmem>>, vector<8x1xf32>
      tpu.vector_store %arg10[%c0_22, %c0_23], %53 {strides = array<i32>} : memref<8x1xf32, #tpu.memory_space<vmem>>, vector<8x1xf32>,
      %c0_24 = arith.constant 0 : index
      %c0_25 = arith.constant 0 : index
      %55 = vector.load %arg11[%c0_24, %c0_25] : memref<8x32xf32, #tpu.memory_space<vmem>>, vector<8x32xf32>
      %56 = vector.broadcast %45 : vector<8x1xf32> to vector<8x32xf32>
      %57 = arith.mulf %56, %55 : vector<8x32xf32>
      %58 = arith.truncf %48 : vector<8x8xf32> to vector<8x8xbf16>
      %c0_26 = arith.constant 0 : index
      %c0_27 = arith.constant 0 : index
      %c0_28 = arith.constant 0 : index
      %59 = vector.load %arg5[%c0_26, %c0_27, %c0_28] : memref<1x8x32xbf16, #tpu.memory_space<vmem>>, vector<1x8x32xbf16>
      %60 = vector.shape_cast %59 : vector<1x8x32xbf16> to vector<8x32xbf16>
      %cst_29 = arith.constant dense<0.000000e+00> : vector<8x32xf32>
      %61 = tpu.matmul %58, %60, %cst_29 {dimension_numbers = #tpu.dot_dimension_numbers<[1], [0], [0], [1], [0, 0, 1, 1], [], []>} : vector<8x8xbf16>, vector<8x32xbf16>, vector<8x32xf32> -> vector<8x32xf32>
      %62 = arith.addf %57, %61 : vector<8x32xf32>
      %c0_30 = arith.constant 0 : index
      %c0_31 = arith.constant 0 : index
      %63 = vector.load %arg11[%c0_30, %c0_31] : memref<8x32xf32, #tpu.memory_space<vmem>>, vector<8x32xf32>
      tpu.vector_store %arg11[%c0_30, %c0_31], %62 {strides = array<i32>} : memref<8x32xf32, #tpu.memory_space<vmem>>, vector<8x32xf32>,
      %c0_32 = arith.constant 0 : index
      %c0_33 = arith.constant 0 : index
      %64 = vector.load %arg9[%c0_32, %c0_33] : memref<8x1xf32, #tpu.memory_space<vmem>>, vector<8x1xf32>
      tpu.vector_store %arg9[%c0_32, %c0_33], %43 {strides = array<i32>} : memref<8x1xf32, #tpu.memory_space<vmem>>, vector<8x1xf32>,
    } else {
    }
    %13 = arith.extui %8 : i1 to i32
    %c0_i32_4 = arith.constant 0 : i32
    %14 = arith.cmpi ne, %13, %c0_i32_4 : i32
    scf.if %14 {
      %c0 = arith.constant 0 : index
      %c0_8 = arith.constant 0 : index
      %c0_9 = arith.constant 0 : index
      %20 = vector.load %arg3[%c0, %c0_8, %c0_9] : memref<1x8x32xbf16, #tpu.memory_space<vmem>>, vector<1x8x32xbf16>
      %21 = vector.shape_cast %20 : vector<1x8x32xbf16> to vector<8x32xbf16>
      %c0_10 = arith.constant 0 : index
      %c0_11 = arith.constant 0 : index
      %c0_12 = arith.constant 0 : index
      %22 = vector.load %arg4[%c0_10, %c0_11, %c0_12] : memref<1x8x32xbf16, #tpu.memory_space<vmem>>, vector<1x8x32xbf16>
      %23 = vector.shape_cast %22 : vector<1x8x32xbf16> to vector<8x32xbf16>
      %cst = arith.constant dense<0.000000e+00> : vector<8x8xf32>
      %24 = tpu.matmul %21, %23, %cst {dimension_numbers = #tpu.dot_dimension_numbers<[1], [1], [0], [0], [0, 0, 1, 0], [], []>} : vector<8x32xbf16>, vector<8x32xbf16>, vector<8x8xf32> -> vector<8x8xf32>
      %cst_13 = arith.constant 0.176776692 : f32
      %25 = vector.broadcast %cst_13 : f32 to vector<8x8xf32>
      %26 = arith.mulf %24, %25 : vector<8x8xf32>
      %cst_14 = arith.constant 9.99999982E-14 : f32
      %27 = vector.broadcast %cst_14 : f32 to vector<8x8xf32>
      %28 = arith.addf %26, %27 : vector<8x8xf32>
      %c0_15 = arith.constant 0 : index
      %c0_16 = arith.constant 0 : index
      %29 = vector.load %arg9[%c0_15, %c0_16] : memref<8x1xf32, #tpu.memory_space<vmem>>, vector<8x1xf32>
      %cst_17 = arith.constant dense<0xFF800000> : vector<8xf32>
      %30 = vector.multi_reduction <maximumf>, %28, %cst_17 [1] : vector<8x8xf32> to vector<8xf32>
      %31 = vector.shape_cast %30 : vector<8xf32> to vector<8x1xf32>
      %32 = arith.maximumf %29, %31 : vector<8x1xf32>
      %33 = arith.subf %29, %32 : vector<8x1xf32>
      %34 = math.exp %33 : vector<8x1xf32>
      %35 = vector.broadcast %32 : vector<8x1xf32> to vector<8x8xf32>
      %36 = arith.subf %28, %35 : vector<8x8xf32>
      %37 = math.exp %36 : vector<8x8xf32>
      %c0_18 = arith.constant 0 : index
      %c0_19 = arith.constant 0 : index
      %38 = vector.load %arg10[%c0_18, %c0_19] : memref<8x1xf32, #tpu.memory_space<vmem>>, vector<8x1xf32>
      %39 = arith.mulf %34, %38 : vector<8x1xf32>
      %cst_20 = arith.constant dense<0.000000e+00> : vector<8xf32>
      %40 = vector.multi_reduction <add>, %37, %cst_20 [1] : vector<8x8xf32> to vector<8xf32>
      %41 = vector.shape_cast %40 : vector<8xf32> to vector<8x1xf32>
      %42 = arith.addf %39, %41 : vector<8x1xf32>
      %c0_21 = arith.constant 0 : index
      %c0_22 = arith.constant 0 : index
      %43 = vector.load %arg10[%c0_21, %c0_22] : memref<8x1xf32, #tpu.memory_space<vmem>>, vector<8x1xf32>
      tpu.vector_store %arg10[%c0_21, %c0_22], %42 {strides = array<i32>} : memref<8x1xf32, #tpu.memory_space<vmem>>, vector<8x1xf32>,
      %c0_23 = arith.constant 0 : index
      %c0_24 = arith.constant 0 : index
      %44 = vector.load %arg11[%c0_23, %c0_24] : memref<8x32xf32, #tpu.memory_space<vmem>>, vector<8x32xf32>
      %45 = vector.broadcast %34 : vector<8x1xf32> to vector<8x32xf32>
      %46 = arith.mulf %45, %44 : vector<8x32xf32>
      %47 = arith.truncf %37 : vector<8x8xf32> to vector<8x8xbf16>
      %c0_25 = arith.constant 0 : index
      %c0_26 = arith.constant 0 : index
      %c0_27 = arith.constant 0 : index
      %48 = vector.load %arg5[%c0_25, %c0_26, %c0_27] : memref<1x8x32xbf16, #tpu.memory_space<vmem>>, vector<1x8x32xbf16>
      %49 = vector.shape_cast %48 : vector<1x8x32xbf16> to vector<8x32xbf16>
      %cst_28 = arith.constant dense<0.000000e+00> : vector<8x32xf32>
      %50 = tpu.matmul %47, %49, %cst_28 {dimension_numbers = #tpu.dot_dimension_numbers<[1], [0], [0], [1], [0, 0, 1, 1], [], []>} : vector<8x8xbf16>, vector<8x32xbf16>, vector<8x32xf32> -> vector<8x32xf32>
      %51 = arith.addf %46, %50 : vector<8x32xf32>
      %c0_29 = arith.constant 0 : index
      %c0_30 = arith.constant 0 : index
      %52 = vector.load %arg11[%c0_29, %c0_30] : memref<8x32xf32, #tpu.memory_space<vmem>>, vector<8x32xf32>
      tpu.vector_store %arg11[%c0_29, %c0_30], %51 {strides = array<i32>} : memref<8x32xf32, #tpu.memory_space<vmem>>, vector<8x32xf32>,
      %c0_31 = arith.constant 0 : index
      %c0_32 = arith.constant 0 : index
      %53 = vector.load %arg9[%c0_31, %c0_32] : memref<8x1xf32, #tpu.memory_space<vmem>>, vector<8x1xf32>
      tpu.vector_store %arg9[%c0_31, %c0_32], %32 {strides = array<i32>} : memref<8x1xf32, #tpu.memory_space<vmem>>, vector<8x1xf32>,
    } else {
    }
    %15 = arith.extui %6 : i1 to i32
    %c0_i32_5 = arith.constant 0 : i32
    %16 = arith.cmpi ne, %15, %c0_i32_5 : i32
    scf.if %16 {
      %c0 = arith.constant 0 : index
      %c0_8 = arith.constant 0 : index
      %20 = vector.load %arg9[%c0, %c0_8] : memref<8x1xf32, #tpu.memory_space<vmem>>, vector<8x1xf32>
      %cst = arith.constant -9.99999982E-14 : f32
      %21 = vector.broadcast %cst : f32 to vector<8x1xf32>
      %22 = arith.maximumf %20, %21 : vector<8x1xf32>
      %23 = arith.subf %20, %22 : vector<8x1xf32>
      %24 = math.exp %23 : vector<8x1xf32>
      %cst_9 = arith.constant -9.99999982E-14 : f32
      %25 = vector.broadcast %cst_9 : f32 to vector<8x1xf32>
      %26 = arith.subf %25, %22 : vector<8x1xf32>
      %27 = math.exp %26 : vector<8x1xf32>
      %c0_10 = arith.constant 0 : index
      %c0_11 = arith.constant 0 : index
      %c0_12 = arith.constant 0 : index
      %28 = vector.load %arg5[%c0_10, %c0_11, %c0_12] : memref<1x8x32xbf16, #tpu.memory_space<vmem>>, vector<1x8x32xbf16>
      %29 = vector.shape_cast %28 : vector<1x8x32xbf16> to vector<8x32xbf16>
      %30 = arith.extf %29 : vector<8x32xbf16> to vector<8x32xf32>
      %cst_13 = arith.constant dense<0.000000e+00> : vector<32xf32>
      %31 = vector.multi_reduction <add>, %30, %cst_13 [0] : vector<8x32xf32> to vector<32xf32>
      %32 = vector.shape_cast %31 : vector<32xf32> to vector<1x32xf32>
      %c0_14 = arith.constant 0 : index
      %c0_15 = arith.constant 0 : index
      %33 = vector.load %arg10[%c0_14, %c0_15] : memref<8x1xf32, #tpu.memory_space<vmem>>, vector<8x1xf32>
      %34 = arith.mulf %24, %33 : vector<8x1xf32>
      %cst_16 = arith.constant 8.000000e+00 : f32
      %35 = vector.broadcast %cst_16 : f32 to vector<8x1xf32>
      %36 = arith.mulf %35, %27 : vector<8x1xf32>
      %37 = arith.addf %34, %36 : vector<8x1xf32>
      %c0_17 = arith.constant 0 : index
      %c0_18 = arith.constant 0 : index
      %38 = vector.load %arg10[%c0_17, %c0_18] : memref<8x1xf32, #tpu.memory_space<vmem>>, vector<8x1xf32>
      tpu.vector_store %arg10[%c0_17, %c0_18], %37 {strides = array<i32>} : memref<8x1xf32, #tpu.memory_space<vmem>>, vector<8x1xf32>,
      %c0_19 = arith.constant 0 : index
      %c0_20 = arith.constant 0 : index
      %39 = vector.load %arg11[%c0_19, %c0_20] : memref<8x32xf32, #tpu.memory_space<vmem>>, vector<8x32xf32>
      %40 = vector.broadcast %24 : vector<8x1xf32> to vector<8x32xf32>
      %41 = arith.mulf %40, %39 : vector<8x32xf32>
      %42 = vector.broadcast %27 : vector<8x1xf32> to vector<8x32xf32>
      %43 = vector.broadcast %32 : vector<1x32xf32> to vector<8x32xf32>
      %44 = arith.mulf %42, %43 : vector<8x32xf32>
      %45 = arith.addf %41, %44 : vector<8x32xf32>
      %c0_21 = arith.constant 0 : index
      %c0_22 = arith.constant 0 : index
      %46 = vector.load %arg11[%c0_21, %c0_22] : memref<8x32xf32, #tpu.memory_space<vmem>>, vector<8x32xf32>
      tpu.vector_store %arg11[%c0_21, %c0_22], %45 {strides = array<i32>} : memref<8x32xf32, #tpu.memory_space<vmem>>, vector<8x32xf32>,
      %c0_23 = arith.constant 0 : index
      %c0_24 = arith.constant 0 : index
      %47 = vector.load %arg9[%c0_23, %c0_24] : memref<8x1xf32, #tpu.memory_space<vmem>>, vector<8x1xf32>
      tpu.vector_store %arg9[%c0_23, %c0_24], %22 {strides = array<i32>} : memref<8x1xf32, #tpu.memory_space<vmem>>, vector<8x1xf32>,
    } else {
    }
    %c0_i32_6 = arith.constant 0 : i32
    %17 = arith.cmpi eq, %arg2, %c0_i32_6 : i32
    %18 = arith.extui %17 : i1 to i32
    %c0_i32_7 = arith.constant 0 : i32
    %19 = arith.cmpi ne, %18, %c0_i32_7 : i32
    scf.if %19 {
      %c0 = arith.constant 0 : index
      %c0_8 = arith.constant 0 : index
      %20 = vector.load %arg10[%c0, %c0_8] : memref<8x1xf32, #tpu.memory_space<vmem>>, vector<8x1xf32>
      %21 = tpu.reciprocal %20 {approx = true} : vector<8x1xf32> -> vector<8x1xf32>
      %c0_9 = arith.constant 0 : index
      %c0_10 = arith.constant 0 : index
      %22 = vector.load %arg11[%c0_9, %c0_10] : memref<8x32xf32, #tpu.memory_space<vmem>>, vector<8x32xf32>
      %23 = vector.broadcast %21 : vector<8x1xf32> to vector<8x32xf32>
      %24 = arith.mulf %22, %23 : vector<8x32xf32>
      %25 = arith.truncf %24 : vector<8x32xf32> to vector<8x32xbf16>
      %c0_11 = arith.constant 0 : index
      %c0_12 = arith.constant 0 : index
      %26 = vector.load %arg6[%c0_11, %c0_12] : memref<32x16xbf16, #tpu.memory_space<vmem>>, vector<32x16xbf16>
      %cst = arith.constant dense<0.000000e+00> : vector<8x16xf32>
      %27 = tpu.matmul %25, %26, %cst {dimension_numbers = #tpu.dot_dimension_numbers<[1], [0], [0], [1], [0, 0, 1, 1], [], []>} : vector<8x32xbf16>, vector<32x16xbf16>, vector<8x16xf32> -> vector<8x16xf32>
      %c0_13 = arith.constant 0 : index
      %c0_14 = arith.constant 0 : index
      %28 = vector.load %arg7[%c0_13, %c0_14] : memref<1x16xbf16, #tpu.memory_space<vmem>>, vector<1x16xbf16>
      %29 = arith.extf %28 : vector<1x16xbf16> to vector<1x16xf32>
      %30 = vector.broadcast %29 : vector<1x16xf32> to vector<8x16xf32>
      %31 = arith.addf %27, %30 : vector<8x16xf32>
      %c0_15 = arith.constant 0 : index
      %c0_16 = arith.constant 0 : index
      %c0_17 = arith.constant 0 : index
      %32 = vector.load %arg8[%c0_15, %c0_16, %c0_17] : memref<1x8x16xf32, #tpu.memory_space<vmem>>, vector<1x8x16xf32>
      %33 = vector.shape_cast %32 : vector<1x8x16xf32> to vector<8x16xf32>
      %34 = vector.shape_cast %31 : vector<8x16xf32> to vector<1x8x16xf32>
      tpu.vector_store %arg8[%c0_15, %c0_16, %c0_17], %34 {strides = array<i32>} : memref<1x8x16xf32, #tpu.memory_space<vmem>>, vector<1x8x16xf32>,
    } else {
    }
    return
  }
  func.func @transform_0(%arg0: i32, %arg1: i32, %arg2: i32) -> (i32, i32, i32) {
    %c0_i32 = arith.constant 0 : i32
    %c0_i32_0 = arith.constant 0 : i32
    return %arg0, %arg1, %c0_i32 : i32, i32, i32
  }
  func.func @transform_1(%arg0: i32, %arg1: i32, %arg2: i32) -> (i32, i32, i32) {
    %c0_i32 = arith.constant 0 : i32
    %c0_i32_0 = arith.constant 0 : i32
    return %arg0, %arg2, %c0_i32 : i32, i32, i32
  }
  func.func @transform_2(%arg0: i32, %arg1: i32, %arg2: i32) -> (i32, i32, i32) {
    %c0_i32 = arith.constant 0 : i32
    %c0_i32_0 = arith.constant 0 : i32
    return %arg0, %arg2, %c0_i32 : i32, i32, i32
  }
  func.func @transform_3(%arg0: i32, %arg1: i32, %arg2: i32) -> (i32, i32) {
    %c0_i32 = arith.constant 0 : i32
    %c0_i32_0 = arith.constant 0 : i32
    %c0_i32_1 = arith.constant 0 : i32
    return %c0_i32, %c0_i32_0 : i32, i32
  }
  func.func @transform_4(%arg0: i32, %arg1: i32, %arg2: i32) -> (i32, i32) {
    %c0_i32 = arith.constant 0 : i32
    %c0_i32_0 = arith.constant 0 : i32
    %c0_i32_1 = arith.constant 0 : i32
    return %c0_i32, %c0_i32_0 : i32, i32
  }
  func.func @transform_5(%arg0: i32, %arg1: i32, %arg2: i32) -> (i32, i32, i32) {
    %c0_i32 = arith.constant 0 : i32
    %c0_i32_0 = arith.constant 0 : i32
    return %arg0, %arg1, %c0_i32 : i32, i32, i32
  }
}

</mosaic_0001>

<bundles_post_ra>
// kernel: tpu_custom_call.1
= control target key start
LH: loop header
LB: loop body
LE: loop exit
PB: predicated region body
PF: predicated region fallthrough
CT: control target
= control target key end

     0   :  { %10 = vsyncpa [#allocation6], 0  ;;  %s1245_s0 = inlined_call_operand.vmem [shape: bf16[2,8,32], index: 0, kind: input, shape index: {}]   ;;  %s1246_s1 = inlined_call_operand.vmem [shape: bf16[2,8,32], index: 1, kind: input, shape index: {}]   ;;  %s1247_s2 = inlined_call_operand.vmem [shape: bf16[2,8,32], index: 2, kind: input, shape index: {}]   ;;  %s1248_s3 = inlined_call_operand.vmem [shape: bf16[32,16], index: 3, kind: input, shape index: {}]   ;;  %s1249_s4 = inlined_call_operand.vmem [shape: bf16[1,16], index: 4, kind: input, shape index: {}]   ;;  %s1250_s5 = inlined_call_operand.hbm [shape: f32[2,8,16], index: 5, kind: output, shape index: {}]  }
   0x1   :  { %12 = vsyncpa [#allocation6 + $0x1], 0  ;;  %s1085_s18 = smov 0   ;;  %s1087_s19 = smov 0  }
   0x2   :  { %s1089_s20 = smov 0   ;;  %s1091_s21 = smov 0  }
   0x3   :  { %s1093_s22 = smov 0   ;;  %s1095_s23 = smov 0  }
   0x4 LB: > { %s854_s24 = sadd.s32 4294967295, %s1048_s23   ;;  %s855_s25 = sadd.s32 4294967294, %s1048_s23   ;;  %s1048_s23 = sphi %s1095_s23, %s18_s23   ;;  %s1044_s22 = sphi %s1093_s22, %s1257_s22   ;;  %s1040_s21 = sphi %s1091_s21, %s1256_s21   ;;  %s1036_s20 = sphi %s1089_s20, %s1255_s20   ;;  %s1032_s19 = sphi %s1087_s19, %s1254_s19   ;;  %s1028_s18 = sphi %s1085_s18, %s1253_s18  }
   0x5   : > { %s37_s26 = sadd.s32 1, %s1044_s22  ;;  %s172_s27 = sadd.s32 1, %s1036_s20 }
   0x6   : > { %p39_p0 = scmp.ge.s32.totalorder %s37_s26, 2  ;;  %p182_p1 = scmp.ne.s32.totalorder %s1036_s20, %s1032_s19 }
   0x7   : > { %p183_p2 = scmp.eq.s32.totalorder %s854_s24, 1  ;;  %p188_p3 = scmp.ne.s32.totalorder %s1032_s19, %s1028_s18 }
   0x8   : > { %s1259_s26 = smov (%p39_p0, %s37_s26), 0  ;;  %p189_p5 = scmp.eq.s32.totalorder %s855_s25, 1 }
   0x9   : > { %p1125_p4 = por %p183_p2, %p182_p1  ;;  %s167_s29 = ssub.s32 %s1044_s22, %s1259_s26 }
   0xa   : > { %p858_p6 = scmp.ge.s32.totalorder %s1048_s23, 1  ;;  %p170_p7 = scmp.eq.s32.totalorder %s167_s29, 0 }
   0xb   : > { %p1132_p8 = por %p189_p5, %p188_p3  ;;  %p243_p9 = scmp.lt.s32.totalorder %s1048_s23, 3 }
   0xc   : > { %s1138_s6 = scalar_select %p170_p7, %s1036_s20, %s172_s27  }
   0xd   : > { %p244_p10 = pnand %p858_p6, %p243_p9 }
   0xe   : > { %p287_p11 = scmp.lt.s32.totalorder (!%p244_p10), %s1040_s21, 1  ;;  %vm316_vm0 = vcmask (!%p244_p10), 261120   ;;  %v1050_v0 = vmov (!%p244_p10), 0.0   ;;  %vm1051_vm1 = vmmov (!%p244_p10), 0   ;;  %vm313_vm2 = vcmask (!%p244_p10), 7168   ;;  %v962_v31 = vld [vmem:[%s1248_s3] sm:$0xff] (!%p244_p10)  }
   0xf   : > { %247 = sbr.rel (%p244_p10) target bundleno = 1064 (0x428), region = 40  ;;  %881 = vmatprep.subr.bf16.mxu0 (!%p244_p10), %v1050_v0  ;;  %317 = vst.msk [vmem:[#allocation4] sm:$0xff] (!%p244_p10), %vm316_vm0, %v1050_v0  ;;  %883 = vmatprep.mubr.msk.bf16.mxu0 (!%p244_p10), %vm1051_vm1, %v1050_v0  ;;  %v1052_v4 = vmov (!%p244_p10), -inf   ;;  %v379_v5 = vlaneseq (!%p244_p10)  ;;  %vm390_vm4 = vcmask (!%p244_p10), 64512   ;;  %v1053_v16 = vmov (!%p244_p10), 0   ;;  %v963_v38 = vld [vmem:[%s1248_s3 + $0x8] sm:$0xff] (!%p244_p10)  }
  0x10   : > { %887 = vmatprep.subr.bf16.mxu1 (!%p244_p10), %v1050_v0  ;;  %889 = vmatprep.mubr.msk.bf16.mxu1 (!%p244_p10), %vm1051_vm1, %v1050_v0  ;;  %314 = vst.msk [vmem:[#allocation2] sm:$0xff] (!%p244_p10), %vm313_vm2, %v1052_v4  ;;  %315 = vst.msk [vmem:[#allocation3] sm:$0xff] (!%p244_p10), %vm313_vm2, %v1050_v0  ;;  %vm426_vm5 = vcmask (!%p244_p10), 1043456   ;;  %v671_v51 = vld [vmem:[%s1249_s4] sm:$0x1] (!%p244_p10)  ;;  %vm733_vm6 = vcmask (!%p244_p10), 130048  }
  0x11   : > { %v1165_v6 = vshrl.u32 (!%p244_p10), %v379_v5, 7  ;;  %v384_v7 = vand.u32 (!%p244_p10), 127, %v379_v5  ;;  %960 = vset.pattern.permute.xlu0 (!%p244_p10), %v1053_v16  ;;  %961 = vset.pattern.permute.xlu1 (!%p244_p10), %v1053_v16  ;;  %v672_v52 = vunpack.c.l.bf16 (!%p244_p10), %v671_v51  ;;  %s1054_s24 = smov (!%p244_p10), [#allocation5]  }
  0x12   : > { %s974_s25 = sshll.u32 (!%p244_p10), %s1054_s24, 4  ;;  %s975_s25 = int_to_ptr.vmem [resolvable:$false] %s974_s25 }
  0x13   : > { %vm387_vm3 = vcmp.gt.s32.totalorder (!%p244_p10), %v384_v7, %v1165_v6  ;;  %v675_v53 = vsub.s32 (!%p244_p10), 0, %v1165_v6  ;;  %s976_s27 = scalar_lea.vmem (!%p244_p10), %s975_s25, 256 }
  0x15   : > { %v676_v54 = vrot.slane (!%p244_p10), %v672_v52, %v675_v53 }
  0x16   : > { %s288_s7 = scalar_select %p287_p11, %s1040_s21, 1  ;;  %v414_v39 = vld [vmem:[#allocation4] sm:$0xff] }
  0x17   : > { %v389_v17 = vld [vmem:[#allocation2] sm:$0xff]  ;;  %v406_v32 = vld [vmem:[#allocation3] sm:$0xff] }
  0x18   : > { %s1150_s8 = sshll.u32 %s288_s7, 2  ;;  %s284_s7 = sand.u32 1, %s1032_s19  }
  0x19   : > { %s300_s11 = scalar_lea.vmem %s1246_s1, %s1150_s8  ;;  %s293_s14 = scalar_lea.vmem %s1245_s0, %s1150_s8 }
  0x1a   : > { %v329_v1 = vld [vmem:[%s300_s11] sm:$0xf]  ;;  %s307_s17 = scalar_lea.vmem %s1247_s2, %s1150_s8  ;;  %s859_s10 = sshll.u32 %s284_s7, 3 }
  0x1b   : > { %v335_v2 = vsel %vm316_vm0, %v329_v1, 0  ;;  %v328_v3 = vld [vmem:[%s293_s14] sm:$0xf]  ;;  %s871_s11 = sshll.u32 %s1040_s21, 7  ;;  %s286_s12 = scalar_lea.vmem [#allocation5], %s859_s10 }
  0x1c   : > { %882 = vmatpush3.bf16.xpose.msra.mxu0 %v335_v2  ;;  %v422_v21 = vld [vmem:[%s307_s17] sm:$0xf]  ;;  %s750_s13 = sshll.u32 %s286_s12, 4  ;;  %s1198_s16 = scalar_lea.hbm %s1250_s5, %s871_s11  ;;  %s1200_s13 = int_to_ptr.vmem [resolvable:$true] %s750_s13 }
  0x1d   : > { %v428_v22 = vsel %vm426_vm5, %v422_v21, 0  ;;  %s736_s21 = scalar_lea.sflag [#allocation6], %s284_s7  ;;  %s970_s17 = scalar_lea.vmem %s1200_s13, 128 }
  0x1e   : > { %888 = vmatpush3.bf16.msra.mxu1 %v428_v22  ;;  %p971_p12 = scmp.ne.s32.totalorder %s1200_s13, %s970_s17  ;;  %p977_p1 = scmp.lt.s32.totalorder %s1200_s13, %s975_s25 }
  0x1f   : > { %893 = vmatprep.subr.bf16.mxu1 %v1050_v0  ;;  %p978_p2 = scmp.lt.s32.totalorder %s976_s27, %s970_s17 }
  0x20   : > { %p972_p13 = pnand %p971_p12, %p1125_p4 }
  0x21   : > { %p979_p3 = por %p978_p2, %p977_p1 }
  0x22   : > { %p973_p0 = pneg %p972_p13 }
  0x23   : > { %884 = vmatmul.mubr.msk.bf16.vlgmr.msra.gmra.mrb[0].mxu0 %vm316_vm0, %v328_v3 }
  0x24   : > { %p980_p5 = pnand %p979_p3, %p973_p0 }
  0xf6   : > { %v371_v8 = vpop.f32.mrb[0].mxu0 }
  0xf7   : > { %v377_v9 = vmul.f32 0.17677669, %v371_v8  ;;  %v885_v10 = vpop.f32.mrb[1].mxu0 }
  0xf8   : > { %v374_v11 = vpop.f32.mrb[2].mxu0 }
  0xf9   : > { %v378_v12 = vadd.f32 1e-13, %v377_v9  ;;  %v886_v13 = vpop.f32.mrb[3].mxu0 }
  0xfb   : > { %v388_v14 = vsel %vm387_vm3, -1e-13, %v378_v12 }
  0xfc   : > { %v391_v15 = vsel %vm390_vm4, %v388_v14, -inf }
  0xfd   : > { %392 = vmax.xlane.f32.xlu0 %v391_v15 }
 0x18a   : > { %v393_v18 = vpop.xlane.xlu0 %392 }
 0x18b   : > { %v394_v19 = vmax.f32 %v389_v17, %v393_v18 }
 0x18d   : > { %v395_v20 = vsub.f32 %v389_v17, %v394_v19  ;;  %472 = vst.msk [vmem:[#allocation2] sm:$0xff] %vm313_vm2, %v394_v19  ;;  %400 = vperm.xlu0 %960, %v394_v19  }
 0x18f   : > { %v396_v29 = vmul.f32 1.442695, %v395_v20 }
 0x20c   : > { %v401_v23 = vpop.permute.xlu0 %400 }
 0x20d   : > { %v403_v24 = vsub.f32 %v388_v14, %v401_v23 }
 0x20f   : > { %v404_v25 = vmul.f32 1.442695, %v403_v24 }
 0x211   : > { %964 = vpow2.f32 %v404_v25 }
 0x212   : > { %966 = vpow2.f32 %v396_v29 }
 0x21b   : > { %v965_v26 = vpop.eup %964 }
 0x21c   : > { %v408_v27 = vsel %vm390_vm4, %v965_v26, 0.0  ;;  %v421_v28 = vpack.c.bf16 %v965_v26, %v965_v26  ;;  %v967_v30 = vpop.eup %966 }
 0x21d   : > { %409 = vadd.xlane.f32.xlu1 %v408_v27  ;;  %v407_v33 = vmul.f32 %v967_v30, %v406_v32 }
 0x21e   : > { %890 = vmatmul.mubr.msk.bf16.vlgmr.msra.gmra.mrb[0].mxu1 %vm390_vm4, %v421_v28 }
 0x21f   : > { %897 = vmatprep.mubr.msk.bf16.mxu1 %vm1051_vm1, %v1050_v0  ;;  %894 = vmatpush3.bf16.msra.mxu1 %v962_v31 }
 0x220   : > { %895 = vmatprep.subr.bf16.mxu1 %v1050_v0 }
 0x223   : > { %896 = vmatpush3.bf16.msra.mxu1 %v963_v38 }
 0x22e   : > { %417 = vperm.xlu1 %961, %v967_v30  }
 0x2aa   : > { %v410_v34 = vpop.xlane.xlu1 %409 }
 0x2ab   : > { %v411_v35 = vadd.f32 %v410_v34, %v407_v33 }
 0x2ad   : > { %413 = vst.msk [vmem:[#allocation3] sm:$0xff] %vm313_vm2, %v411_v35 }
 0x2ae   : > { %v418_v40 = vpop.permute.xlu1 %417 }
 0x2af   : > { %v420_v41 = vmul.f32 %v418_v40, %v414_v39 }
 0x2b4   : > { %v657_v36 = vld [vmem:[#allocation3] sm:$0xff] }
 0x2b5   : > { %968 = vrcp.f32 %v657_v36 }
 0x2bf   : > { %v969_v37 = vpop.eup %968 }
 0x2c0   : > { %662 = vperm.xlu1 %961, %v969_v37  }
 0x2f1   : > { %v464_v42 = vpop.f32.mrb[0].mxu1 }
 0x2f2   : > { %v470_v43 = vadd.f32 %v464_v42, %v420_v41  ;;  %v891_v44 = vpop.f32.mrb[1].mxu1 }
 0x2f3   : > { %v467_v45 = vpop.f32.mrb[2].mxu1 }
 0x2f4   : > { %471 = vst.msk [vmem:[#allocation4] sm:$0xff] %vm316_vm0, %v470_v43  ;;  %v892_v46 = vpop.f32.mrb[3].mxu1 }
 0x2fb   : > { %v659_v47 = vld [vmem:[#allocation4] sm:$0xff] }
 0x33f   : > { %v663_v48 = vpop.permute.xlu1 %662 }
 0x340   : > { %v665_v49 = vmul.f32 %v663_v48, %v659_v47 }
 0x342   : > { %v666_v50 = vpack.c.bf16 %v665_v49, %v665_v49 }
 0x344   : > { %898 = vmatmul.mubr.msk.bf16.vlgmr.msra.gmra.mrb[4].mxu1 %vm316_vm0, %v666_v50 }
 0x417   : > { %v727_v55 = vpop.f32.mrb[4].mxu1 }
 0x418   : > { %v728_v56 = vadd.f32 %v727_v55, %v676_v54  ;;  %v899_v57 = vpop.f32.mrb[5].mxu1 }
 0x419   : > { %v730_v58 = vpop.f32.mrb[6].mxu1 }
 0x41a   : > { %v900_v59 = vpop.f32.mrb[7].mxu1  ;;  %734 = vst.msk [vmem:[%s286_s12] sm:$0xff] %vm733_vm6, %v728_v56 }
 0x41b   : > { %983 = shalt.err (!%p980_p5)
}
 0x41c   : > { %s984_s29 = scalar_lea.hbm %s1198_s16, 128  ;;  %s988_s9 = scalar_lea.hbm %s1250_s5, 256 }
 0x41d   : > { %p985_p6 = scmp.ne.s32.totalorder %s1198_s16, %s984_s29  ;;  %p989_p10 = scmp.lt.u32.totalorder %s1198_s16, %s1250_s5 }
 0x41e   : > { %p990_p11 = scmp.lt.u32.totalorder %s988_s9, %s984_s29  ;;  %p992_p13 = scmp.lt.u32.totalorder %s984_s29, %s1198_s16 }
 0x41f   : > { %p986_p7 = pnand %p985_p6, %p1125_p4 }
 0x420   : > { %p991_p12 = por %p990_p11, %p989_p10 }
 0x421   : > { %p987_p9 = pneg %p986_p7 }
 0x422   : > { %p993_p0 = por %p992_p13, %p991_p12 }
 0x424   : > { %p994_p1 = pnand %p993_p0, %p987_p9 }
 0x426   : > { %997 = shalt.err (!%p994_p1)
}
 0x427   : > { %901 = dma.vmem_to_hbm [thread:$0]  (%p1125_p4), %s1200_s13, 128, %s1198_s16, %s736_s21  }
 0x428 PF: > { %p907_p2 = scmp.ge.s32.totalorder %s1048_s23, 2  ;;  %s762_s12 = sand.u32 1, %s1028_s18  }
 0x429   : > { %s763_s14 = scalar_lea.sflag [#allocation6], %s762_s12 }
 0x42a   : > { %p904_p3 = pnand %p907_p2, %p1132_p8 }
 0x42c   : > { %1023 = dma.done.wait (!%p904_p3), %s763_s14, 128  }
 0x42d   : > { %1025 = vsyncadd (!%p904_p3), %s763_s14, 4294967168  ;;  %s18_s23 = sadd.s32 1, %s1048_s23   ;;  %s1253_s18 = smov %s1032_s19 }
 0x42e   : > { %p15_p5 = scmp.ge.s32.totalorder %s18_s23, 4   ;;  %s1254_s19 = smov %s1036_s20 }
 0x42f   : > { %s1255_s20 = smov %s1138_s6  ;;  %s1256_s21 = smov %s1044_s22 }
 0x430   : > { %s1257_s22 = smov %s1259_s26  ;;  %17 = sbr.rel (!%p15_p5) target bundleno = 4 (0x4), region = 101 }
 0x437   :  { %768 = vsyncpa [#allocation6], 1 }
 0x438   :  { %770 = vsyncpa [#allocation6 + $0x1], 1 }

</bundles_post_ra>
